<compile_context>
chip_gen: v5e
topology: v5e:2x2
jax: 0.10.0
libtpu: 0.0.40
codegen_flags: <defaults>
</compile_context>

<pallas_src>
import jax
import jax.numpy as jnp
from jax.experimental import pallas as pl
from jax.experimental.pallas import tpu as pltpu


def _round_up(x, m):
    return (x + m - 1) // m * m


def _neighbour_kernel(words_ref,     # SMEM (Np,) int32          (scalar prefetch)
                      table_ref,     # HBM  (vocab, 768) f32     (memory_space=pl.ANY)
                      pos_ref,       # VMEM (TN, 2) f32
                      wwe_ref,       # VMEM (768, D)
                      bwe_ref,       # VMEM (1, D)
                      w1_ref,        # VMEM (2, 128)
                      b1_ref,        # VMEM (1, 128)
                      w2_ref,        # VMEM (128, D)
                      b2_ref,        # VMEM (1, D)
                      out_ref,       # VMEM (TN, 2*D)
                      emb_buf,       # VMEM scratch (TN, 768)
                      gather_sem):   # DMA semaphore
    tile_n = emb_buf.shape[0]
    base = pl.program_id(0) * tile_n

    # ---- fused embedding gather: DMA tile_n table rows HBM -> VMEM ----
    @pl.loop(0, tile_n)
    def _issue(j):
        row = words_ref[base + j]
        pltpu.make_async_copy(table_ref.at[pl.ds(row, 1)],
                              emb_buf.at[pl.ds(j, 1)],
                              gather_sem).start()

    @pl.loop(0, tile_n)
    def _wait(_):
        # All row copies are the same size and signal the same semaphore.
        pltpu.make_async_copy(table_ref.at[pl.ds(0, 1)],
                              emb_buf.at[pl.ds(0, 1)],
                              gather_sem).wait()

    # ---- word branch: Linear(768, D) on the MXU ----
    word = jnp.dot(emb_buf[...], wwe_ref[...],
                   preferred_element_type=jnp.float32) + bwe_ref[...]

    # ---- position branch ----
    # Linear(2, 128): a K=2 matmul wastes the MXU -> two broadcast FMAs on the VPU.
    h = (pos_ref[:, 0:1] * w1_ref[0:1, :]
         + pos_ref[:, 1:2] * w1_ref[1:2, :]
         + b1_ref[...])
    h = jnp.maximum(h, 0.0)
    # TODO(synk): dropout (p=0.5) is identity in eval mode; not modeled here.
    p = jnp.dot(h, w2_ref[...],
                preferred_element_type=jnp.float32) + b2_ref[...]
    p = jnp.maximum(p, 0.0)

    # ---- single full-tile store (lane-dense when D is a multiple of 128) ----
    out_ref[...] = jnp.concatenate([word, p], axis=-1).astype(out_ref.dtype)


def neighbour_embedding(words, positions, params, *, tile_n=512):
    """words: (B, S) int32; positions: (B, S, 2) float -> (B, S, 2*D) float32."""
    emb_table = params["emb_table"]          # (vocab, 768)
    wwe, bwe = params["wwe"], params["bwe"]  # (768, D), (1, D)
    w1, b1 = params["w1"], params["b1"]      # (2, 128), (1, 128)
    w2, b2 = params["w2"], params["b2"]      # (128, D), (1, D)

    B, S = words.shape
    N = B * S
    D = wwe.shape[1]
    H = emb_table.shape[1]

    # Large row tiles amortize the ~0.35us/step grid overhead and fill the MXU M
    # dim; cap at the 8-aligned token count so tiny inputs stay tiny.
    tile_n = _round_up(max(8, min(tile_n, _round_up(N, 8))), 8)
    Np = _round_up(N, tile_n)
    grid = (Np // tile_n,)

    words_flat = words.reshape(N).astype(jnp.int32)
    pos_flat = positions.reshape(N, 2).astype(jnp.float32)
    if Np != N:
        # Padded rows gather table row 0 and are sliced off below.
        words_flat = jnp.pad(words_flat, (0, Np - N))
        pos_flat = jnp.pad(pos_flat, ((0, Np - N), (0, 0)))

    # index_maps receive the scalar-prefetch ref as a trailing positional arg.
    row_spec = lambda cols: pl.BlockSpec((tile_n, cols), lambda i, words: (i, 0))
    full_spec = lambda r, c: pl.BlockSpec((r, c), lambda i, words: (0, 0))

    flops = 2 * Np * H * D + 2 * Np * 2 * 128 + 2 * Np * 128 * D
    bytes_accessed = (
        Np * 4                    # word ids
        + Np * H * 4              # gathered embedding rows
        + Np * 2 * 4              # positions
        + Np * 2 * D * 4          # output
        + (H * D + D + 2 * 128 + 128 + 128 * D + D) * 4)  # weights

    out = pl.pallas_call(
        _neighbour_kernel,
        out_shape=jax.ShapeDtypeStruct((Np, 2 * D), jnp.float32),
        grid_spec=pltpu.PrefetchScalarGridSpec(
            num_scalar_prefetch=1,                 # words -> SMEM, drives the DMA gather
            grid=grid,
            in_specs=[
                pl.BlockSpec(memory_space=pl.ANY),  # embedding table stays in HBM
                row_spec(2),                        # positions (tile_n, 2)
                full_spec(H, D),                    # wwe
                full_spec(1, D),                    # bwe
                full_spec(2, 128),                  # w1
                full_spec(1, 128),                  # b1
                full_spec(128, D),                  # w2
                full_spec(1, D),                    # b2
            ],
            out_specs=row_spec(2 * D),
            scratch_shapes=[
                pltpu.VMEM((tile_n, H), emb_table.dtype),  # gathered rows
                pltpu.SemaphoreType.DMA,                   # gather completion
            ],
        ),
        compiler_params=pltpu.CompilerParams(
            dimension_semantics=("parallel",)),
        cost_estimate=pl.CostEstimate(
            flops=flops, transcendentals=0, bytes_accessed=bytes_accessed),
    )(words_flat, emb_table, pos_flat, wwe, bwe, w1, b1, w2, b2)

    return out[:N].reshape(B, S, 2 * D)


def make_params(key, vocab_size, dimension):
    ks = jax.random.split(key, 7)
    scale = 0.02
    return {
        # stand-in for LayoutLMv3 word-embedding table (deterministic init)
        "emb_table": scale * jax.random.normal(ks[0], (vocab_size, 768), jnp.float32),
        "wwe": scale * jax.random.normal(ks[1], (768, dimension), jnp.float32),
        "bwe": scale * jax.random.normal(ks[2], (1, dimension), jnp.float32),
        "w1": scale * jax.random.normal(ks[3], (2, 128), jnp.float32),
        "b1": scale * jax.random.normal(ks[4], (1, 128), jnp.float32),
        "w2": scale * jax.random.normal(ks[5], (128, dimension), jnp.float32),
        "b2": scale * jax.random.normal(ks[6], (1, dimension), jnp.float32),
    }


def _reference(words, positions, params):
    emb = jnp.take(params["emb_table"], words, axis=0)
    word = emb @ params["wwe"] + params["bwe"][0]
    h = jax.nn.relu(positions @ params["w1"] + params["b1"][0])
    p = jax.nn.relu(h @ params["w2"] + params["b2"][0])
    return jnp.concatenate([word, p], axis=2)


if __name__ == "__main__":
    key = jax.random.PRNGKey(0)
    k_params, k_words, k_pos = jax.random.split(key, 3)

    vocab_size = 100
    dimension = 32
    B, S = 2, 8

    params = make_params(k_params, vocab_size, dimension)
    words = jax.random.randint(k_words, (B, S), 0, vocab_size, dtype=jnp.int32)
    positions = jax.random.uniform(k_pos, (B, S, 2), jnp.float32)

    out = neighbour_embedding(words, positions, params)
    out = jax.block_until_ready(out)

    ref = _reference(words, positions, params)
    assert out.shape == (B, S, 2 * dimension)
    assert jnp.allclose(out, ref, atol=1e-5, rtol=1e-5)

    print("KERNEL_OK")
</pallas_src>

<mosaic_0001>
module attributes {stable_mosaic.version = 11 : i64} {
  func.func @_neighbour_kernel(%arg0: i32, %arg1: memref<16xi32, #tpu.memory_space<smem>>, %arg2: memref<100x768xf32, #tpu.memory_space<any>>, %arg3: memref<16x2xf32, #tpu.memory_space<vmem>>, %arg4: memref<768x32xf32, #tpu.memory_space<vmem>>, %arg5: memref<1x32xf32, #tpu.memory_space<vmem>>, %arg6: memref<2x128xf32, #tpu.memory_space<vmem>>, %arg7: memref<1x128xf32, #tpu.memory_space<vmem>>, %arg8: memref<128x32xf32, #tpu.memory_space<vmem>>, %arg9: memref<1x32xf32, #tpu.memory_space<vmem>>, %arg10: memref<16x64xf32, #tpu.memory_space<vmem>>, %arg11: memref<16x768xf32, #tpu.memory_space<vmem>>, %arg12: memref<!tpu.dma_semaphore, #tpu.memory_space<semaphore_mem>>) attributes {dimension_semantics = [#tpu.dimension_semantics<parallel>], iteration_bounds = array<i64: 1>, scalar_prefetch = 1 : i64, scratch_operands = 2 : i64, tpu.core_type = #tpu.core_type<tc>, window_params = [{}, {transform_indices = @transform_1, window_bounds = array<i64: 16, 2>}, {pipeline_mode = #tpu.pipeline_mode<synchronous>, transform_indices = @transform_2, window_bounds = array<i64: 768, 32>}, {pipeline_mode = #tpu.pipeline_mode<synchronous>, transform_indices = @transform_3, window_bounds = array<i64: 1, 32>}, {pipeline_mode = #tpu.pipeline_mode<synchronous>, transform_indices = @transform_4, window_bounds = array<i64: 2, 128>}, {pipeline_mode = #tpu.pipeline_mode<synchronous>, transform_indices = @transform_5, window_bounds = array<i64: 1, 128>}, {pipeline_mode = #tpu.pipeline_mode<synchronous>, transform_indices = @transform_6, window_bounds = array<i64: 128, 32>}, {pipeline_mode = #tpu.pipeline_mode<synchronous>, transform_indices = @transform_7, window_bounds = array<i64: 1, 32>}, {transform_indices = @transform_8, window_bounds = array<i64: 16, 64>}]} {
    %c16_i32 = arith.constant 16 : i32
    %0 = arith.muli %arg0, %c16_i32 : i32
    %c0_i32 = arith.constant 0 : i32
    %c16_i32_0 = arith.constant 16 : i32
    %1 = arith.addi %c0_i32, %c16_i32_0 : i32
    %c1_i32 = arith.constant 1 : i32
    scf.for %arg13 = %c0_i32 to %1 step %c1_i32  : i32 {
      %c1_i32_28 = arith.constant 1 : i32
      %34 = arith.muli %arg13, %c1_i32_28 : i32
      %c0_i32_29 = arith.constant 0 : i32
      %35 = arith.addi %c0_i32_29, %34 : i32
      %36 = arith.addi %0, %35 : i32
      %37 = arith.index_cast %36 : i32 to index
      %38 = memref.load %arg1[%37] : memref<16xi32, #tpu.memory_space<smem>>
      %c0_i32_30 = arith.constant 0 : i32
      %39 = tpu.memref_slice %arg2[%38, %c0_i32_30] : memref<100x768xf32, #tpu.memory_space<any>> -> memref<1x768xf32, #tpu.memory_space<any>>
      %c0_i32_31 = arith.constant 0 : i32
      %40 = tpu.memref_slice %arg11[%35, %c0_i32_31] : memref<16x768xf32, #tpu.memory_space<vmem>> -> memref<1x768xf32, #tpu.memory_space<vmem>>
      tpu.enqueue_dma source(%39 : memref<1x768xf32, #tpu.memory_space<any>>) target(%40 : memref<1x768xf32, #tpu.memory_space<vmem>>) target_semaphore(%arg12 : memref<!tpu.dma_semaphore, #tpu.memory_space<semaphore_mem>>)
    }
    %c16_i32_1 = arith.constant 16 : i32
    %c0_i32_2 = arith.constant 0 : i32
    %c16_i32_3 = arith.constant 16 : i32
    %2 = arith.addi %c0_i32_2, %c16_i32_3 : i32
    %c1_i32_4 = arith.constant 1 : i32
    scf.for %arg13 = %c0_i32_2 to %2 step %c1_i32_4  : i32 {
      %c0_i32_28 = arith.constant 0 : i32
      %c0_i32_29 = arith.constant 0 : i32
      %34 = tpu.memref_slice %arg2[%c0_i32_28, %c0_i32_29] : memref<100x768xf32, #tpu.memory_space<any>> -> memref<1x768xf32, #tpu.memory_space<any>>
      %c0_i32_30 = arith.constant 0 : i32
      %c0_i32_31 = arith.constant 0 : i32
      %35 = tpu.memref_slice %arg11[%c0_i32_30, %c0_i32_31] : memref<16x768xf32, #tpu.memory_space<vmem>> -> memref<1x768xf32, #tpu.memory_space<vmem>>
      tpu.wait_dma2 semaphore(%arg12 : memref<!tpu.dma_semaphore, #tpu.memory_space<semaphore_mem>>) src(%34 : memref<1x768xf32, #tpu.memory_space<any>>) dst(%35 : memref<1x768xf32, #tpu.memory_space<vmem>>)
    }
    %c0 = arith.constant 0 : index
    %c0_5 = arith.constant 0 : index
    %3 = vector.load %arg11[%c0, %c0_5] : memref<16x768xf32, #tpu.memory_space<vmem>>, vector<16x768xf32>
    %c0_6 = arith.constant 0 : index
    %c0_7 = arith.constant 0 : index
    %4 = vector.load %arg4[%c0_6, %c0_7] : memref<768x32xf32, #tpu.memory_space<vmem>>, vector<768x32xf32>
    %cst = arith.constant dense<0.000000e+00> : vector<16x32xf32>
    %5 = tpu.matmul %3, %4, %cst {dimension_numbers = #tpu.dot_dimension_numbers<[1], [0], [0], [1], [0, 0, 1, 1], [], []>} : vector<16x768xf32>, vector<768x32xf32>, vector<16x32xf32> -> vector<16x32xf32>
    %c0_8 = arith.constant 0 : index
    %c0_9 = arith.constant 0 : index
    %6 = vector.load %arg5[%c0_8, %c0_9] : memref<1x32xf32, #tpu.memory_space<vmem>>, vector<1x32xf32>
    %7 = vector.broadcast %6 : vector<1x32xf32> to vector<16x32xf32>
    %8 = arith.addf %5, %7 : vector<16x32xf32>
    %c0_10 = arith.constant 0 : index
    %c0_11 = arith.constant 0 : index
    %9 = vector.load %arg3[%c0_10, %c0_11] : memref<16x2xf32, #tpu.memory_space<vmem>>, vector<16x1xf32>
    %c0_12 = arith.constant 0 : index
    %c0_13 = arith.constant 0 : index
    %10 = vector.load %arg6[%c0_12, %c0_13] : memref<2x128xf32, #tpu.memory_space<vmem>>, vector<1x128xf32>
    %11 = vector.broadcast %9 : vector<16x1xf32> to vector<16x128xf32>
    %12 = vector.broadcast %10 : vector<1x128xf32> to vector<16x128xf32>
    %13 = arith.mulf %11, %12 : vector<16x128xf32>
    %c0_14 = arith.constant 0 : index
    %c1 = arith.constant 1 : index
    %14 = vector.load %arg3[%c0_14, %c1] : memref<16x2xf32, #tpu.memory_space<vmem>>, vector<16x1xf32>
    %c1_15 = arith.constant 1 : index
    %c0_16 = arith.constant 0 : index
    %15 = vector.load %arg6[%c1_15, %c0_16] : memref<2x128xf32, #tpu.memory_space<vmem>>, vector<1x128xf32>
    %16 = vector.broadcast %14 : vector<16x1xf32> to vector<16x128xf32>
    %17 = vector.broadcast %15 : vector<1x128xf32> to vector<16x128xf32>
    %18 = arith.mulf %16, %17 : vector<16x128xf32>
    %19 = arith.addf %13, %18 : vector<16x128xf32>
    %c0_17 = arith.constant 0 : index
    %c0_18 = arith.constant 0 : index
    %20 = vector.load %arg7[%c0_17, %c0_18] : memref<1x128xf32, #tpu.memory_space<vmem>>, vector<1x128xf32>
    %21 = vector.broadcast %20 : vector<1x128xf32> to vector<16x128xf32>
    %22 = arith.addf %19, %21 : vector<16x128xf32>
    %cst_19 = arith.constant 0.000000e+00 : f32
    %23 = vector.broadcast %cst_19 : f32 to vector<16x128xf32>
    %24 = arith.maximumf %22, %23 : vector<16x128xf32>
    %c0_20 = arith.constant 0 : index
    %c0_21 = arith.constant 0 : index
    %25 = vector.load %arg8[%c0_20, %c0_21] : memref<128x32xf32, #tpu.memory_space<vmem>>, vector<128x32xf32>
    %cst_22 = arith.constant dense<0.000000e+00> : vector<16x32xf32>
    %26 = tpu.matmul %24, %25, %cst_22 {dimension_numbers = #tpu.dot_dimension_numbers<[1], [0], [0], [1], [0, 0, 1, 1], [], []>} : vector<16x128xf32>, vector<128x32xf32>, vector<16x32xf32> -> vector<16x32xf32>
    %c0_23 = arith.constant 0 : index
    %c0_24 = arith.constant 0 : index
    %27 = vector.load %arg9[%c0_23, %c0_24] : memref<1x32xf32, #tpu.memory_space<vmem>>, vector<1x32xf32>
    %28 = vector.broadcast %27 : vector<1x32xf32> to vector<16x32xf32>
    %29 = arith.addf %26, %28 : vector<16x32xf32>
    %cst_25 = arith.constant 0.000000e+00 : f32
    %30 = vector.broadcast %cst_25 : f32 to vector<16x32xf32>
    %31 = arith.maximumf %29, %30 : vector<16x32xf32>
    %32 = tpu.concatenate %8, %31 in 1 : vector<16x32xf32>, vector<16x32xf32> -> vector<16x64xf32>
    %c0_26 = arith.constant 0 : index
    %c0_27 = arith.constant 0 : index
    %33 = vector.load %arg10[%c0_26, %c0_27] : memref<16x64xf32, #tpu.memory_space<vmem>>, vector<16x64xf32>
    tpu.vector_store %arg10[%c0_26, %c0_27], %32 {strides = array<i32>} : memref<16x64xf32, #tpu.memory_space<vmem>>, vector<16x64xf32>,
    return
  }
  func.func @transform_1(%arg0: i32, %arg1: memref<16xi32, #tpu.memory_space<smem>>) -> (i32, i32) {
    %c0_i32 = arith.constant 0 : i32
    %c0_i32_0 = arith.constant 0 : i32
    return %arg0, %c0_i32 : i32, i32
  }
  func.func @transform_2(%arg0: i32, %arg1: memref<16xi32, #tpu.memory_space<smem>>) -> (i32, i32) {
    %c0_i32 = arith.constant 0 : i32
    %c0_i32_0 = arith.constant 0 : i32
    %c0_i32_1 = arith.constant 0 : i32
    return %c0_i32, %c0_i32_0 : i32, i32
  }
  func.func @transform_3(%arg0: i32, %arg1: memref<16xi32, #tpu.memory_space<smem>>) -> (i32, i32) {
    %c0_i32 = arith.constant 0 : i32
    %c0_i32_0 = arith.constant 0 : i32
    %c0_i32_1 = arith.constant 0 : i32
    return %c0_i32, %c0_i32_0 : i32, i32
  }
  func.func @transform_4(%arg0: i32, %arg1: memref<16xi32, #tpu.memory_space<smem>>) -> (i32, i32) {
    %c0_i32 = arith.constant 0 : i32
    %c0_i32_0 = arith.constant 0 : i32
    %c0_i32_1 = arith.constant 0 : i32
    return %c0_i32, %c0_i32_0 : i32, i32
  }
  func.func @transform_5(%arg0: i32, %arg1: memref<16xi32, #tpu.memory_space<smem>>) -> (i32, i32) {
    %c0_i32 = arith.constant 0 : i32
    %c0_i32_0 = arith.constant 0 : i32
    %c0_i32_1 = arith.constant 0 : i32
    return %c0_i32, %c0_i32_0 : i32, i32
  }
  func.func @transform_6(%arg0: i32, %arg1: memref<16xi32, #tpu.memory_space<smem>>) -> (i32, i32) {
    %c0_i32 = arith.constant 0 : i32
    %c0_i32_0 = arith.constant 0 : i32
    %c0_i32_1 = arith.constant 0 : i32
    return %c0_i32, %c0_i32_0 : i32, i32
  }
  func.func @transform_7(%arg0: i32, %arg1: memref<16xi32, #tpu.memory_space<smem>>) -> (i32, i32) {
    %c0_i32 = arith.constant 0 : i32
    %c0_i32_0 = arith.constant 0 : i32
    %c0_i32_1 = arith.constant 0 : i32
    return %c0_i32, %c0_i32_0 : i32, i32
  }
  func.func @transform_8(%arg0: i32, %arg1: memref<16xi32, #tpu.memory_space<smem>>) -> (i32, i32) {
    %c0_i32 = arith.constant 0 : i32
    %c0_i32_0 = arith.constant 0 : i32
    return %arg0, %c0_i32 : i32, i32
  }
}

</mosaic_0001>

<bundles_post_ra>
// kernel: tpu_custom_call.1
= control target key start
LH: loop header
LB: loop body
LE: loop exit
PB: predicated region body
PF: predicated region fallthrough
CT: control target
= control target key end

     0   :  { %s617_s12 = smov [#allocation5]   ;;  %s1047_s0 = inlined_call_operand.vmem [shape: s32[16], index: 0, kind: input, shape index: {}]   ;;  %s1048_s1 = inlined_call_operand.vmem [shape: f32[100,768], index: 1, kind: input, shape index: {}]   ;;  %s1049_s2 = inlined_call_operand.vmem [shape: f32[16,2], index: 2, kind: input, shape index: {}]   ;;  %s1050_s3 = inlined_call_operand.vmem [shape: f32[768,32], index: 3, kind: input, shape index: {}]   ;;  %s1051_s4 = inlined_call_operand.vmem [shape: f32[1,32], index: 4, kind: input, shape index: {}]   ;;  %s1052_s5 = inlined_call_operand.vmem [shape: f32[2,128], index: 5, kind: input, shape index: {}]   ;;  %s1053_s6 = inlined_call_operand.vmem [shape: f32[1,128], index: 6, kind: input, shape index: {}]   ;;  %s1054_s7 = inlined_call_operand.vmem [shape: f32[128,32], index: 7, kind: input, shape index: {}]   ;;  %s1055_s8 = inlined_call_operand.vmem [shape: f32[1,32], index: 8, kind: input, shape index: {}]   ;;  %s1056_s9 = inlined_call_operand.hbm [shape: f32[16,64], index: 9, kind: output, shape index: {}]  }
   0x1   :  { %s15_s11 = sshll.u32 %s1047_s0, 4  ;;  %s16_s11 = int_to_ptr.vmem [resolvable:$true] %s15_s11 }
   0x2   :  { %18 = dma.vmem_to_smem %s16_s11, 16, %s617_s12, [#allocation4] }
   0x3   :  { %603 = dma.done.wait [#allocation4], 16 }
   0x4   :  { %604 = vsyncadd [#allocation4], 4294967280 }
   0x5   :  { %21 = sfence }
   0x6   :  { %22 = vsyncpa [#allocation7], 0  ;;  %s677_s13 = smov 0  }
   0x7 LB: > { %s45_s14 = sld [smem:[#allocation5 + %s611_s13]]  ;;  %s51_s15 = sshrl.u32 %s611_s13, 3  ;;  %s611_s13 = sphi %s677_s13, %s43_s13  }
   0x8   : > { %s53_s16 = smul.u32 48, %s51_s15  ;;  %s52_s17 = sand.u32 7, %s611_s13  }
   0xa   : > { %s54_s18 = sadd.s32 %s53_s16, %s52_s17 }
   0xb   : > { %s55_s25 = scalar_lea.vmem [#allocation2], %s54_s18 }
   0xd   : > { %s46_s19 = sshrl.u32 %s45_s14, 3  ;;  %s47_s0 = sand.u32 7, %s45_s14  }
   0xe   : > { %s48_s20 = smul.u32 48, %s46_s19 }
  0x10   : > { %s49_s21 = sadd.s32 %s48_s20, %s47_s0 }
  0x11   : > { %s50_s24 = scalar_lea.vmem %s1048_s1, %s49_s21 }
  0x12   : > { %v70_v0 = vld [vmem:[%s50_s24] sm:$0x1]  ;;  %v72_v1 = vld [vmem:[%s50_s24 + $0x8] sm:$0x1]  ;;  %v74_v2 = vld [vmem:[%s50_s24 + $0x10] sm:$0x1] }
  0x13   : > { %71 = vst [vmem:[%s55_s25] sm:$0x1] %v70_v0  ;;  %v76_v3 = vld [vmem:[%s50_s24 + $0x18] sm:$0x1]  ;;  %v78_v4 = vld [vmem:[%s50_s24 + $0x20] sm:$0x1] }
  0x14   : > { %73 = vst [vmem:[%s55_s25 + $0x8] sm:$0x1] %v72_v1  ;;  %v80_v5 = vld [vmem:[%s50_s24 + $0x28] sm:$0x1] }
  0x15   : > { %75 = vst [vmem:[%s55_s25 + $0x10] sm:$0x1] %v74_v2 }
  0x16   : > { %77 = vst [vmem:[%s55_s25 + $0x18] sm:$0x1] %v76_v3 }
  0x17   : > { %79 = vst [vmem:[%s55_s25 + $0x20] sm:$0x1] %v78_v4 }
  0x18   : > { %81 = vst [vmem:[%s55_s25 + $0x28] sm:$0x1] %v80_v5 }
  0x19   : > { %109 = vsyncadd [#allocation3], 96  ;;  %s43_s13 = sadd.s32 1, %s611_s13  }
  0x1a   : > { %p40_p0 = scmp.ge.s32.totalorder %s43_s13, 16  }
  0x1b   :  { %s613_s26 = smov (%p40_p0), 0  }
  0x1c   :  { %42 = sbr.rel (!%p40_p0) target bundleno = 7 (0x7), region = 98 }
  0x21 LB: > { %605 = dma.done.wait [#allocation3], 96  ;;  %s615_s26 = sphi %s613_s26, %s115_s26  }
  0x22   : > { %606 = vsyncadd [#allocation3], 4294967200  ;;  %s115_s26 = sadd.s32 1, %s615_s26  }
  0x23   : > { %p112_p1 = scmp.ge.s32.totalorder %s115_s26, 16  }
  0x24   :  { %v370_v6 = vld [vmem:[%s1049_s2 + $0x8] sm:$0xff] (%p112_p1)  ;;  %v369_v7 = vld [vmem:[%s1049_s2] sm:$0xff] (%p112_p1)  ;;  %v146_v8 = vld [vmem:[%s1050_s3 + $0x78] sm:$0xff] (%p112_p1)  ;;  %v618_v9 = vmov (%p112_p1), 0   ;;  %v619_v25 = vmov (%p112_p1), 1   ;;  %vm460_vm0 = vcmask (%p112_p1), 261120  }
  0x25   :  { %114 = sbr.rel (!%p112_p1) target bundleno = 33 (0x21), region = 109  ;;  %552 = vset.pattern.permute.xlu1 (%p112_p1), %v618_v9  ;;  %550 = vset.pattern.permute.xlu0 (%p112_p1), %v618_v9  ;;  %v162_v10 = vld [vmem:[%s1050_s3 + $0xf8] sm:$0xff] (%p112_p1)  ;;  %v145_v12 = vld [vmem:[%s1050_s3 + $0x70] sm:$0xff] (%p112_p1)  ;;  %v144_v16 = vld [vmem:[%s1050_s3 + $0x68] sm:$0xff] (%p112_p1)  ;;  %vm463_vm1 = vcmask (%p112_p1), 523264   ;;  %s472_s24 = sshll.u32 (%p112_p1), %s1056_s9, 4  ;;  %s473_s24 = int_to_ptr.hbm [resolvable:$true] %s472_s24 }
  0x26   :  { %v194_v11 = vld [vmem:[%s1050_s3 + $0x1f8] sm:$0xff] (%p112_p1)  ;;  %379 = vperm.xlu1 (%p112_p1), %552, %v370_v6   ;;  %374 = vperm.xlu0 (%p112_p1), %550, %v369_v7   ;;  %v161_v13 = vld [vmem:[%s1050_s3 + $0xf0] sm:$0xff] (%p112_p1)  ;;  %v160_v17 = vld [vmem:[%s1050_s3 + $0xe8] sm:$0xff] (%p112_p1)  ;;  %s622_s25 = smov (%p112_p1), 128   ;;  %s623_s26 = smov (%p112_p1), 8  }
  0x27   :  { %231 = vmatpush.msra.mxu0 (%p112_p1), %v146_v8  ;;  %254 = vmatpush.msra.mxu1 (%p112_p1), %v162_v10  ;;  %v193_v14 = vld [vmem:[%s1050_s3 + $0x1f0] sm:$0xff] (%p112_p1)  ;;  %v178_v15 = vld [vmem:[%s1050_s3 + $0x178] sm:$0xff] (%p112_p1)  ;;  %v192_v18 = vld [vmem:[%s1050_s3 + $0x1e8] sm:$0xff] (%p112_p1) }
  0x28   :  { %300 = vmatpush.msra.mxu3 (%p112_p1), %v194_v11  ;;  %277 = vmatpush.msra.mxu2 (%p112_p1), %v178_v15  ;;  %v177_v19 = vld [vmem:[%s1050_s3 + $0x170] sm:$0xff] (%p112_p1)  ;;  %v143_v20 = vld [vmem:[%s1050_s3 + $0x60] sm:$0xff] (%p112_p1)  ;;  %v176_v22 = vld [vmem:[%s1050_s3 + $0x168] sm:$0xff] (%p112_p1) }
  0x29   :  { %232 = vmatpush.msra.mxu0 (%p112_p1), %v145_v12  ;;  %255 = vmatpush.msra.mxu1 (%p112_p1), %v161_v13  ;;  %v159_v21 = vld [vmem:[%s1050_s3 + $0xe0] sm:$0xff] (%p112_p1)  ;;  %v142_v23 = vld [vmem:[%s1050_s3 + $0x58] sm:$0xff] (%p112_p1)  ;;  %v141_v28 = vld [vmem:[%s1050_s3 + $0x50] sm:$0xff] (%p112_p1) }
  0x2a   :  { %301 = vmatpush.msra.mxu3 %v193_v14  ;;  %278 = vmatpush.msra.mxu2 %v177_v19  ;;  %v191_v24 = vld [vmem:[%s1050_s3 + $0x1e0] sm:$0xff]  ;;  %v158_v26 = vld [vmem:[%s1050_s3 + $0xd8] sm:$0xff]  ;;  %v157_v30 = vld [vmem:[%s1050_s3 + $0xd0] sm:$0xff] }
  0x2b   :  { %233 = vmatpush.msra.mxu0 %v144_v16  ;;  %256 = vmatpush.msra.mxu1 %v160_v17  ;;  %v175_v27 = vld [vmem:[%s1050_s3 + $0x160] sm:$0xff]  ;;  %v190_v29 = vld [vmem:[%s1050_s3 + $0x1d8] sm:$0xff]  ;;  %v140_v32 = vld [vmem:[%s1050_s3 + $0x48] sm:$0xff] }
  0x2c   :  { %302 = vmatpush.msra.mxu3 %v192_v18  ;;  %279 = vmatpush.msra.mxu2 %v176_v22  ;;  %v174_v31 = vld [vmem:[%s1050_s3 + $0x158] sm:$0xff]  ;;  %v189_v33 = vld [vmem:[%s1050_s3 + $0x1d0] sm:$0xff]  ;;  %v156_v34 = vld [vmem:[%s1050_s3 + $0xc8] sm:$0xff] }
  0x2d   :  { %234 = vmatpush.msra.mxu0 %v143_v20  ;;  %257 = vmatpush.msra.mxu1 %v159_v21  ;;  %v173_v35 = vld [vmem:[%s1050_s3 + $0x150] sm:$0xff]  ;;  %v139_v36 = vld [vmem:[%s1050_s3 + $0x40] sm:$0xff]  ;;  %v188_v37 = vld [vmem:[%s1050_s3 + $0x1c8] sm:$0xff] }
  0x2e   :  { %553 = vset.pattern.permute.xlu1 %v619_v25  ;;  %551 = vset.pattern.permute.xlu0 %v619_v25  ;;  %v155_v38 = vld [vmem:[%s1050_s3 + $0xc0] sm:$0xff]  ;;  %v172_v39 = vld [vmem:[%s1050_s3 + $0x148] sm:$0xff]  ;;  %v138_v40 = vld [vmem:[%s1050_s3 + $0x38] sm:$0xff] }
  0x2f   :  { %391 = vperm.xlu1 %553, %v370_v6   ;;  %387 = vperm.xlu0 %551, %v369_v7   ;;  %v187_v41 = vld [vmem:[%s1050_s3 + $0x1c0] sm:$0xff]  ;;  %v154_v42 = vld [vmem:[%s1050_s3 + $0xb8] sm:$0xff]  ;;  %v137_v44 = vld [vmem:[%s1050_s3 + $0x30] sm:$0xff] }
  0x30   :  { %235 = vmatpush.msra.mxu0 %v142_v23  ;;  %303 = vmatpush.msra.mxu3 %v191_v24  ;;  %v171_v43 = vld [vmem:[%s1050_s3 + $0x140] sm:$0xff]  ;;  %v186_v45 = vld [vmem:[%s1050_s3 + $0x1b8] sm:$0xff]  ;;  %v153_v46 = vld [vmem:[%s1050_s3 + $0xb0] sm:$0xff] }
  0x31   :  { %258 = vmatpush.msra.mxu1 %v158_v26  ;;  %280 = vmatpush.msra.mxu2 %v175_v27  ;;  %v170_v47 = vld [vmem:[%s1050_s3 + $0x138] sm:$0xff]  ;;  %v136_v48 = vld [vmem:[%s1050_s3 + $0x28] sm:$0xff]  ;;  %v185_v49 = vld [vmem:[%s1050_s3 + $0x1b0] sm:$0xff] }
  0x32   :  { %236 = vmatpush.msra.mxu0 %v141_v28  ;;  %304 = vmatpush.msra.mxu3 %v190_v29  ;;  %v152_v50 = vld [vmem:[%s1050_s3 + $0xa8] sm:$0xff]  ;;  %v169_v51 = vld [vmem:[%s1050_s3 + $0x130] sm:$0xff]  ;;  %v135_v52 = vld [vmem:[%s1050_s3 + $0x20] sm:$0xff] }
  0x33   :  { %259 = vmatpush.msra.mxu1 %v157_v30  ;;  %281 = vmatpush.msra.mxu2 %v174_v31  ;;  %v184_v53 = vld [vmem:[%s1050_s3 + $0x1a8] sm:$0xff]  ;;  %v151_v54 = vld [vmem:[%s1050_s3 + $0xa0] sm:$0xff]  ;;  %v134_v56 = vld [vmem:[%s1050_s3 + $0x18] sm:$0xff] }
  0x34   :  { %237 = vmatpush.msra.mxu0 %v140_v32  ;;  %305 = vmatpush.msra.mxu3 %v189_v33  ;;  %v168_v55 = vld [vmem:[%s1050_s3 + $0x128] sm:$0xff]  ;;  %v183_v57 = vld [vmem:[%s1050_s3 + $0x1a0] sm:$0xff]  ;;  %v150_v58 = vld [vmem:[%s1050_s3 + $0x98] sm:$0xff] }
  0x35   :  { %260 = vmatpush.msra.mxu1 %v156_v34  ;;  %282 = vmatpush.msra.mxu2 %v173_v35  ;;  %v167_v59 = vld [vmem:[%s1050_s3 + $0x120] sm:$0xff]  ;;  %v133_v60 = vld [vmem:[%s1050_s3 + $0x10] sm:$0xff]  ;;  %v182_v61 = vld [vmem:[%s1050_s3 + $0x198] sm:$0xff] }
  0x36   :  { %238 = vmatpush.msra.mxu0 %v139_v36  ;;  %306 = vmatpush.msra.mxu3 %v188_v37  ;;  %v149_v62 = vld [vmem:[%s1050_s3 + $0x90] sm:$0xff]  ;;  %v166_v63 = vld [vmem:[%s1050_s3 + $0x118] sm:$0xff]  ;;  %v132_v0 = vld [vmem:[%s1050_s3 + $0x8] sm:$0xff] }
  0x37   :  { %261 = vmatpush.msra.mxu1 %v155_v38  ;;  %283 = vmatpush.msra.mxu2 %v172_v39  ;;  %v181_v1 = vld [vmem:[%s1050_s3 + $0x190] sm:$0xff]  ;;  %v131_v2 = vld [vmem:[%s1050_s3] sm:$0xff]  ;;  %v148_v3 = vld [vmem:[%s1050_s3 + $0x88] sm:$0xff] }
  0x38   :  { %239 = vmatpush.msra.mxu0 %v138_v40  ;;  %307 = vmatpush.msra.mxu3 %v187_v41  ;;  %v180_v4 = vld [vmem:[%s1050_s3 + $0x188] sm:$0xff]  ;;  %v165_v5 = vld [vmem:[%s1050_s3 + $0x110] sm:$0xff]  ;;  %v210_v6 = vld [vmem:[%s1050_s3 + $0x278] sm:$0xff] }
  0x39   :  { %262 = vmatpush.msra.mxu1 %v154_v42  ;;  %284 = vmatpush.msra.mxu2 %v171_v43  ;;  %v147_v7 = vld [vmem:[%s1050_s3 + $0x80] sm:$0xff]  ;;  %v226_v9 = vld [vmem:[%s1050_s3 + $0x2f8] sm:$0xff]  ;;  %v209_v10 = vld [vmem:[%s1050_s3 + $0x270] sm:$0xff] }
  0x3a   :  { %240 = vmatpush.msra.mxu0 %v137_v44  ;;  %308 = vmatpush.msra.mxu3 %v186_v45  ;;  %v179_v8 = vld [vmem:[%s1050_s3 + $0x180] sm:$0xff]  ;;  %v164_v11 = vld [vmem:[%s1050_s3 + $0x108] sm:$0xff]  ;;  %v225_v12 = vld [vmem:[%s1050_s3 + $0x2f0] sm:$0xff] }
  0x3b   :  { %263 = vmatpush.msra.mxu1 %v153_v46  ;;  %285 = vmatpush.msra.mxu2 %v170_v47  ;;  %v208_v13 = vld [vmem:[%s1050_s3 + $0x268] sm:$0xff]  ;;  %v163_v14 = vld [vmem:[%s1050_s3 + $0x100] sm:$0xff]  ;;  %v422_v17 = vld [vmem:[%s1054_s7 + $0x78] sm:$0xff] }
  0x3c   :  { %241 = vmatpush.msra.mxu0 %v136_v48  ;;  %309 = vmatpush.msra.mxu3 %v185_v49  ;;  %v224_v15 = vld [vmem:[%s1050_s3 + $0x2e8] sm:$0xff]  ;;  %v207_v16 = vld [vmem:[%s1050_s3 + $0x260] sm:$0xff]  ;;  %v206_v19 = vld [vmem:[%s1050_s3 + $0x258] sm:$0xff] }
  0x3d   :  { %264 = vmatpush.msra.mxu1 %v152_v50  ;;  %286 = vmatpush.msra.mxu2 %v169_v51  ;;  %v223_v18 = vld [vmem:[%s1050_s3 + $0x2e0] sm:$0xff]  ;;  %v421_v20 = vld [vmem:[%s1054_s7 + $0x70] sm:$0xff]  ;;  %v222_v21 = vld [vmem:[%s1050_s3 + $0x2d8] sm:$0xff] }
  0x3e   :  { %242 = vmatpush.msra.mxu0 %v135_v52  ;;  %310 = vmatpush.msra.mxu3 %v184_v53  ;;  %v205_v22 = vld [vmem:[%s1050_s3 + $0x250] sm:$0xff]  ;;  %v420_v23 = vld [vmem:[%s1054_s7 + $0x68] sm:$0xff]  ;;  %v419_v26 = vld [vmem:[%s1054_s7 + $0x60] sm:$0xff] }
  0x3f   :  { %265 = vmatpush.msra.mxu1 %v151_v54  ;;  %287 = vmatpush.msra.mxu2 %v168_v55  ;;  %v221_v24 = vld [vmem:[%s1050_s3 + $0x2d0] sm:$0xff]  ;;  %v204_v25 = vld [vmem:[%s1050_s3 + $0x248] sm:$0xff]  ;;  %v203_v28 = vld [vmem:[%s1050_s3 + $0x240] sm:$0xff] }
  0x40   :  { %243 = vmatpush.msra.mxu0 %v134_v56  ;;  %311 = vmatpush.msra.mxu3 %v183_v57  ;;  %v220_v27 = vld [vmem:[%s1050_s3 + $0x2c8] sm:$0xff]  ;;  %v418_v29 = vld [vmem:[%s1054_s7 + $0x58] sm:$0xff]  ;;  %v119_v30 = vld [vmem:[#allocation2] sm:$0xff] }
  0x41   :  { %266 = vmatpush.msra.mxu1 %v150_v58  ;;  %288 = vmatpush.msra.mxu2 %v167_v59  ;;  %v202_v31 = vld [vmem:[%s1050_s3 + $0x238] sm:$0xff]  ;;  %v219_v32 = vld [vmem:[%s1050_s3 + $0x2c0] sm:$0xff]  ;;  %v417_v33 = vld [vmem:[%s1054_s7 + $0x50] sm:$0xff] }
  0x42   :  { %244 = vmatpush.msra.mxu0 %v133_v60  ;;  %312 = vmatpush.msra.mxu3 %v182_v61  ;;  %v120_v34 = vld [vmem:[#allocation2 + $0x8] sm:$0xff]  ;;  %v122_v35 = vld [vmem:[#allocation2 + $0x18] sm:$0xff]  ;;  %v201_v36 = vld [vmem:[%s1050_s3 + $0x230] sm:$0xff] }
  0x43   :  { %267 = vmatpush.msra.mxu1 %v149_v62  ;;  %289 = vmatpush.msra.mxu2 %v166_v63  ;;  %v218_v37 = vld [vmem:[%s1050_s3 + $0x2b8] sm:$0xff]  ;;  %v416_v38 = vld [vmem:[%s1054_s7 + $0x48] sm:$0xff]  ;;  %v217_v40 = vld [vmem:[%s1050_s3 + $0x2b0] sm:$0xff] }
  0x44   :  { %245 = vmatpush.msra.mxu0 %v132_v0  ;;  %313 = vmatpush.msra.mxu3 %v181_v1  ;;  %v200_v39 = vld [vmem:[%s1050_s3 + $0x228] sm:$0xff]  ;;  %v415_v41 = vld [vmem:[%s1054_s7 + $0x40] sm:$0xff]  ;;  %v121_v42 = vld [vmem:[#allocation2 + $0x10] sm:$0xff] }
  0x45   :  { %268 = vmatpush.msra.mxu1 %v148_v3  ;;  %290 = vmatpush.msra.mxu2 %v165_v5  ;;  %v199_v43 = vld [vmem:[%s1050_s3 + $0x220] sm:$0xff]  ;;  %v216_v44 = vld [vmem:[%s1050_s3 + $0x2a8] sm:$0xff]  ;;  %v414_v45 = vld [vmem:[%s1054_s7 + $0x38] sm:$0xff] }
  0x46   :  { %246 = vmatpush.msra.mxu0 %v131_v2  ;;  %314 = vmatpush.msra.mxu3 %v180_v4  ;;  %v125_v46 = vld [vmem:[#allocation2 + $0x30] sm:$0xff]  ;;  %v198_v47 = vld [vmem:[%s1050_s3 + $0x218] sm:$0xff]  ;;  %v215_v48 = vld [vmem:[%s1050_s3 + $0x2a0] sm:$0xff] }
  0x47   :  { %269 = vmatpush.msra.mxu1 %v147_v7  ;;  %291 = vmatpush.msra.mxu2 %v164_v11  ;;  %v413_v49 = vld [vmem:[%s1054_s7 + $0x30] sm:$0xff]  ;;  %v126_v50 = vld [vmem:[#allocation2 + $0x38] sm:$0xff]  ;;  %v128_v51 = vld [vmem:[#allocation2 + $0x48] sm:$0xff] }
  0x48   :  { %323 = vmatpush.msrb.mxu0 %v210_v6  ;;  %315 = vmatpush.msra.mxu3 %v179_v8  ;;  %v197_v52 = vld [vmem:[%s1050_s3 + $0x210] sm:$0xff]  ;;  %v214_v53 = vld [vmem:[%s1050_s3 + $0x298] sm:$0xff]  ;;  %v412_v54 = vld [vmem:[%s1054_s7 + $0x28] sm:$0xff] }
  0x49   :  { %346 = vmatpush.msrb.mxu1 %v226_v9  ;;  %292 = vmatpush.msra.mxu2 %v163_v14  ;;  %v196_v55 = vld [vmem:[%s1050_s3 + $0x208] sm:$0xff]  ;;  %v213_v56 = vld [vmem:[%s1050_s3 + $0x290] sm:$0xff]  ;;  %v411_v57 = vld [vmem:[%s1054_s7 + $0x20] sm:$0xff] }
  0x4a   :  { %511 = vmatpush.msrb.mxu3 %v210_v6  ;;  %324 = vmatpush.msrb.mxu0 %v209_v10  ;;  %v127_v58 = vld [vmem:[#allocation2 + $0x40] sm:$0xff]  ;;  %v212_v60 = vld [vmem:[%s1050_s3 + $0x288] sm:$0xff]  ;;  %v410_v61 = vld [vmem:[%s1054_s7 + $0x18] sm:$0xff] }
  0x4b   :  { %347 = vmatpush.msrb.mxu1 %v225_v12  ;;  %427 = vmatpush.msrb.mxu2 %v422_v17  ;;  %v195_v59 = vld [vmem:[%s1050_s3 + $0x200] sm:$0xff]  ;;  %v409_v0 = vld [vmem:[%s1054_s7 + $0x10] sm:$0xff]  ;;  %v124_v2 = vld [vmem:[#allocation2 + $0x28] sm:$0xff] }
  0x4c   :  { %512 = vmatpush.msrb.mxu3 %v209_v10  ;;  %325 = vmatpush.msrb.mxu0 %v208_v13  ;;  %v123_v62 = vld [vmem:[#allocation2 + $0x20] sm:$0xff]  ;;  %v129_v1 = vld [vmem:[#allocation2 + $0x50] sm:$0xff]  ;;  %v408_v3 = vld [vmem:[%s1054_s7 + $0x8] sm:$0xff] }
  0x4d   :  { %348 = vmatpush.msrb.mxu1 %v224_v15  ;;  %428 = vmatpush.msrb.mxu2 %v421_v20  ;;  %v211_v63 = vld [vmem:[%s1050_s3 + $0x280] sm:$0xff]  ;;  %v130_v5 = vld [vmem:[#allocation2 + $0x58] sm:$0xff] }
  0x4e   :  { %513 = vmatpush.msrb.mxu3 %v208_v13  ;;  %326 = vmatpush.msrb.mxu0 %v207_v16  ;;  %v407_v4 = vld [vmem:[%s1054_s7] sm:$0xff] }
  0x4f   :  { %349 = vmatpush.msrb.mxu1 %v223_v18  ;;  %429 = vmatpush.msrb.mxu2 %v420_v23  ;;  %v554_v8 = vld [vmem:[%s1052_s5] ss:$0 sm:$0xff]  ;;  %v555_v9 = vld [vmem:[%s1052_s5 + $0x1] ss:$0 sm:$0xff] }
  0x50   :  { %514 = vmatpush.msrb.mxu3 %v207_v16  ;;  %327 = vmatpush.msrb.mxu0 %v206_v19  ;;  %v556_v14 = vld [vmem:[%s1053_s6] ss:$0 sm:$0xff]  ;;  %s620_s6 = smov 32  }
  0x51   :  { %350 = vmatpush.msrb.mxu1 %v222_v21  ;;  %430 = vmatpush.msrb.mxu2 %v419_v26 }
  0x52   :  { %515 = vmatpush.msrb.mxu3 %v206_v19  ;;  %328 = vmatpush.msrb.mxu0 %v205_v22 }
  0x53   :  { %351 = vmatpush.msrb.mxu1 %v221_v24  ;;  %431 = vmatpush.msrb.mxu2 %v418_v29 }
  0x54   :  { %516 = vmatpush.msrb.mxu3 %v205_v22  ;;  %329 = vmatpush.msrb.mxu0 %v204_v25 }
  0x55   :  { %352 = vmatpush.msrb.mxu1 %v220_v27  ;;  %247 = vmatmul.f32.vlgmr.msra.gmra.mxu0 %v119_v30 }
  0x56   :  { %517 = vmatpush.msrb.mxu3 %v204_v25  ;;  %330 = vmatpush.msrb.mxu0 %v203_v28  ;;  %v558_v25 = vld [vmem:[%s1055_s8] ss:$0 sm:$0xff] }
  0x57   :  { %353 = vmatpush.msrb.mxu1 %v219_v32  ;;  %432 = vmatpush.msrb.mxu2 %v417_v33 }
  0x58   :  { %518 = vmatpush.msrb.mxu3 %v203_v28  ;;  %331 = vmatpush.msrb.mxu0 %v202_v31 }
  0x59   :  { %270 = vmatmul.f32.vlgmr.msra.gmra.mxu1 %v120_v34  ;;  %316 = vmatmul.f32.vlgmr.msra.gmra.mxu3 %v122_v35  ;;  %v557_v34 = vld [vmem:[%s1051_s4] ss:$0 sm:$0xff]  ;;  %s621_s4 = smov [#allocation6]  }
  0x5a   :  { %519 = vmatpush.msrb.mxu3 %v202_v31  ;;  %332 = vmatpush.msrb.mxu0 %v201_v36  ;;  %s470_s8 = sshll.u32 %s621_s4, 4  ;;  %s471_s8 = int_to_ptr.vmem [resolvable:$true] %s470_s8 }
  0x5b   :  { %354 = vmatpush.msrb.mxu1 %v218_v37  ;;  %433 = vmatpush.msrb.mxu2 %v416_v38 }
  0x5c   :  { %520 = vmatpush.msrb.mxu3 %v201_v36  ;;  %333 = vmatpush.msrb.mxu0 %v200_v39 }
  0x5d   :  { %355 = vmatpush.msrb.mxu1 %v217_v40  ;;  %434 = vmatpush.msrb.mxu2 %v415_v41 }
  0x5e   :  { %521 = vmatpush.msrb.mxu3 %v200_v39  ;;  %293 = vmatmul.f32.vlgmr.msra.gmra.mxu2 %v121_v42 }
  0x5f   :  { %334 = vmatpush.msrb.mxu0 %v199_v43  ;;  %356 = vmatpush.msrb.mxu1 %v216_v44 }
  0x60   :  { %435 = vmatpush.msrb.mxu2 %v414_v45  ;;  %250 = vmatmul.f32.gmra.mxu0 %v125_v46 }
  0x61   :  { %522 = vmatpush.msrb.mxu3 %v199_v43  ;;  %335 = vmatpush.msrb.mxu0 %v198_v47 }
  0x62   :  { %357 = vmatpush.msrb.mxu1 %v215_v48  ;;  %436 = vmatpush.msrb.mxu2 %v413_v49 }
  0x63   :  { %273 = vmatmul.f32.gmra.mxu1 %v126_v50  ;;  %319 = vmatmul.f32.gmra.mxu3 %v128_v51 }
  0x64   :  { %336 = vmatpush.msrb.mxu0 %v197_v52  ;;  %523 = vmatpush.msrb.mxu3 %v198_v47 }
  0x65   :  { %358 = vmatpush.msrb.mxu1 %v214_v53  ;;  %437 = vmatpush.msrb.mxu2 %v412_v54 }
  0x66   :  { %337 = vmatpush.msrb.mxu0 %v196_v55  ;;  %524 = vmatpush.msrb.mxu3 %v197_v52 }
  0x67   :  { %359 = vmatpush.msrb.mxu1 %v213_v56  ;;  %438 = vmatpush.msrb.mxu2 %v411_v57 }
  0x68   :  { %338 = vmatpush.msrb.mxu0 %v195_v59  ;;  %296 = vmatmul.f32.gmra.mxu2 %v127_v58 }
  0x69   :  { %525 = vmatpush.msrb.mxu3 %v196_v55  ;;  %360 = vmatpush.msrb.mxu1 %v212_v60 }
  0x6a   :  { %439 = vmatpush.msrb.mxu2 %v410_v61  ;;  %339 = vmatmul.f32.vlgmr.msrb.gmra.mxu0 %v123_v62 }
  0x6b   :  { %526 = vmatpush.msrb.mxu3 %v195_v59  ;;  %361 = vmatpush.msrb.mxu1 %v211_v63 }
  0x6c   :  { %440 = vmatpush.msrb.mxu2 %v409_v0  ;;  %342 = vmatmul.f32.vlgmr.msrb.gmra.mxu3 %v129_v1 }
  0x6d   :  { %362 = vmatmul.f32.vlgmr.msrb.gmra.mxu1 %v124_v2 }
  0x6e   :  { %441 = vmatpush.msrb.mxu2 %v408_v3 }
  0x70   :  { %442 = vmatpush.msrb.mxu2 %v407_v4 }
  0x75   :  { %365 = vmatmul.f32.gmra.mxu1 %v130_v5 }
  0x98   :  { %v375_v6 = vpop.permute.xlu0 %374  ;;  %v380_v7 = vpop.permute.xlu1 %379 }
  0x99   :  { %v383_v12 = vmul.f32 %v554_v8, %v375_v6  ;;  %v384_v15 = vmul.f32 %v554_v8, %v380_v7 }
  0xa1   :  { %v392_v10 = vpop.permute.xlu1 %391  ;;  %v388_v11 = vpop.permute.xlu0 %387 }
  0xa2   :  { %v395_v13 = vmul.f32 %v555_v9, %v388_v11  ;;  %v396_v16 = vmul.f32 %v555_v9, %v392_v10 }
  0xa4   :  { %v397_v17 = vadd.f32 %v395_v13, %v383_v12  ;;  %v398_v19 = vadd.f32 %v396_v16, %v384_v15 }
  0xa6   :  { %v403_v18 = vadd.f32 %v556_v14, %v397_v17  ;;  %v404_v21 = vadd.f32 %v556_v14, %v398_v19 }
  0xa8   :  { %v405_v20 = vmax.f32 %v403_v18, 0.0  ;;  %v406_v22 = vmax.f32 %v404_v21, 0.0 }
  0xaa   :  { %443 = vmatmul.f32.vlgmr.msrb.gmra.mxu2 %v405_v20 }
  0xb2   :  { %446 = vmatmul.f32.gmra.mxu2 %v406_v22 }
  0xd2   :  { %v248_v32 = vpop.f32.mrf.mxu0 }
  0xd3   :  { %v249_v35 = vadd.f32 %v557_v34, %v248_v32 }
  0xd6   :  { %v271_v33 = vpop.f32.mrf.mxu1 }
  0xd7   :  { %v272_v38 = vadd.f32 %v271_v33, %v249_v35 }
  0xdc   :  { %v317_v36 = vpop.f32.mrf.mxu3 }
  0xdd   :  { %v251_v37 = vpop.f32.mrf.mxu0 }
  0xde   :  { %v252_v40 = vadd.f32 %v557_v34, %v251_v37 }
  0xe0   :  { %v274_v39 = vpop.f32.mrf.mxu1 }
  0xe1   :  { %v294_v23 = vpop.f32.mrf.mxu2  ;;  %v275_v43 = vadd.f32 %v274_v39, %v252_v40 }
  0xe2   :  { %v295_v41 = vadd.f32 %v294_v23, %v272_v38 }
  0xe4   :  { %v318_v44 = vadd.f32 %v317_v36, %v295_v41 }
  0xe6   :  { %v320_v42 = vpop.f32.mrf.mxu3 }
  0xe7   :  { %v340_v45 = vpop.f32.mrf.mxu0 }
  0xe8   :  { %v341_v47 = vadd.f32 %v340_v45, %v318_v44 }
  0xea   :  { %v363_v46 = vpop.f32.mrf.mxu1 }
  0xeb   :  { %v297_v24 = vpop.f32.mrf.mxu2  ;;  %v364_v49 = vadd.f32 %v363_v46, %v341_v47 }
  0xec   :  { %v298_v48 = vadd.f32 %v297_v24, %v275_v43 }
  0xee   :  { %v321_v50 = vadd.f32 %v320_v42, %v298_v48 }
  0xef   :  { %v343_v51 = vpop.f32.mrf.mxu3 }
  0xf0   :  { %v344_v54 = vadd.f32 %v343_v51, %v321_v50 }
  0xf2   :  { %v366_v55 = vpop.f32.mrf.mxu1 }
  0xf3   :  { %v367_v56 = vadd.f32 %v366_v55, %v344_v54 }
 0x12d   :  { %v444_v26 = vpop.f32.mrf.mxu2 }
 0x12e   :  { %v445_v27 = vadd.f32 %v558_v25, %v444_v26 }
 0x130   :  { %v450_v28 = vmax.f32 %v445_v27, 0.0 }
 0x132   :  { %454 = vrot.lane.b32.xlu2 %v450_v28, %s620_s6 }
 0x135   :  { %v447_v29 = vpop.f32.mrf.mxu2 }
 0x136   :  { %v448_v30 = vadd.f32 %v558_v25, %v447_v29 }
 0x138   :  { %v451_v31 = vmax.f32 %v448_v30, 0.0 }
 0x13a   :  { %456 = vrot.lane.b32.xlu2 %v451_v31, %s620_s6 }
 0x18c   :  { %v455_v52 = vpop.permute.xlu2 %454 }
 0x18d   :  { %v461_v53 = vsel %vm460_vm0, %v364_v49, %v455_v52 }
 0x18e   :  { %464 = vst.msk [vmem:[#allocation6] sm:$0xff] %vm463_vm1, %v461_v53 }
 0x194   :  { %v457_v57 = vpop.permute.xlu2 %456 }
 0x195   :  { %v462_v58 = vsel %vm460_vm0, %v367_v56, %v457_v57 }
 0x196   :  { %465 = vst.msk [vmem:[#allocation6 + $0x8] sm:$0xff] %vm463_vm1, %v462_v58 }
 0x197   :  { %478 = dma.vmem_to_hbm [thread:$0]  %s471_s8, 256, %s473_s24, [#allocation7], %s622_s25, %s622_s25, %s623_s26  }
 0x198   :  { %607 = dma.done.wait [#allocation7], 256  }
 0x199   :  { %608 = vsyncadd [#allocation7], 4294967040 }
 0x19a   :  { %483 = vsyncpa [#allocation7], 1 }
 0x19b   :  { %484 = vsyncmov [#allocation3] }
 0x19e   :  { %s485_s27 = vpop.sfrf %484 }
 0x19f   :  { %p510_p2 = scmp.ne.s32.totalorder %s485_s27, 0 }
 0x1a1   :  { %489 = shalt.err (%p510_p2)  }

</bundles_post_ra>
